<compile_context>
chip_gen: v5e
topology: v5e:2x2
jax: 0.10.0
libtpu: 0.0.40
codegen_flags: <defaults>
</compile_context>

<pallas_src>
import functools
import math

import jax
import jax.numpy as jnp
from jax import lax
from jax.experimental import pallas as pl
from jax.experimental.pallas import tpu as pltpu

_LANE = 128
_MAX_THW = 32768  # caps the per-step lane-chunk unroll at 256 adds


# ---------------------------------------------------------------------------
# Kernel 1: streaming pooled-sum reduce over H*W (the memory-bound part)
# ---------------------------------------------------------------------------
def _pool_sum_kernel(x_ref, o_ref, acc_ref, *, hw_total, thw, needs_mask):
    # x_ref:   (TBC, THW)   tile of the flattened (B*C, H*W) input, original dtype
    # o_ref:   (TBC, 1)     f32 pooled sums (written on the final H*W step only)
    # acc_ref: (TBC, 128)   f32 lane-partial accumulator (VMEM scratch)
    j = pl.program_id(1)
    n_hw = pl.num_programs(1)

    @pl.when(j == 0)
    def _():
        acc_ref[...] = jnp.zeros_like(acc_ref)

    n_chunks = thw // _LANE

    def accumulate(masked):
        # Pure elementwise VPU adds over 128-lane chunks read straight from the ref
        # (static, aligned slices -> zero-cost views, one vreg slab per chunk).
        acc = acc_ref[...]
        for k in range(n_chunks):
            chunk = x_ref[:, k * _LANE:(k + 1) * _LANE].astype(jnp.float32)
            if masked:
                col = lax.broadcasted_iota(jnp.int32, (1, _LANE), 1) + (j * thw + k * _LANE)
                chunk = jnp.where(col < hw_total, chunk, 0.0)
            acc = acc + chunk
        acc_ref[...] = acc

    if needs_mask:
        # Only the final H*W block has out-of-range lanes; keep every other step mask-free.
        @pl.when(j < n_hw - 1)
        def _():
            accumulate(False)

        @pl.when(j == n_hw - 1)
        def _():
            accumulate(True)
    else:
        accumulate(False)

    @pl.when(j == n_hw - 1)
    def _():
        # Single deferred cross-lane (XLU) reduce per row block.
        o_ref[...] = jnp.sum(acc_ref[...], axis=-1, keepdims=True)


# ---------------------------------------------------------------------------
# Kernel 2: tiny EqualLinear epilogue (scaled GEMM + bias + fused leaky-relu)
# ---------------------------------------------------------------------------
def _eq_linear_epilogue_kernel(p_ref, w_ref, b_ref, o_ref, *, cs):
    # p_ref: (B, C_in)   f32 pooled sums over H*W
    # w_ref: (C_out, C_in) unscaled EqualLinear weight
    # b_ref: (1, C_out)  bias * lr_mul * sqrt(2)
    # o_ref: (B, C_out)
    pooled = p_ref[...]
    w = w_ref[...].astype(jnp.float32)
    # Contract C_in of pooled (axis 1) with C_in of weight (axis 1); no explicit transpose.
    y = lax.dot_general(
        pooled, w,
        dimension_numbers=(((1,), (1,)), ((), ())),
        preferred_element_type=jnp.float32,
    )
    # cs folds: mean (1/HW), EqualLinear scale (lr_mul/sqrt(C_in)), and sqrt(2).
    t = y * cs + b_ref[...]
    o_ref[...] = jnp.where(t >= 0.0, t, 0.2 * t).astype(o_ref.dtype)


# ---------------------------------------------------------------------------
# Sizing helpers
# ---------------------------------------------------------------------------
def _vmem_capacity_bytes():
    try:
        info = pltpu.get_tpu_info()
        cap = getattr(info, "vmem_capacity_bytes", None)
        if cap:
            return int(cap)
    except Exception:
        pass
    return 64 << 20  # conservative (v7x physical VMEM)


def _pick_tiles(rows, hw, itemsize, block_budget):
    """Choose (TBC, THW): THW is a multiple of 128 (<= _MAX_THW), TBC a multiple of 8
    filling the per-block byte budget. No sublane padding anywhere (rows are dense)."""
    thw = min(_MAX_THW, pl.cdiv(hw, _LANE) * _LANE)
    max_rows = max(8, (block_budget // max(1, thw * itemsize)) // 8 * 8)
    rows_pad = pl.cdiv(rows, 8) * 8
    tbc = min(rows_pad, max_rows)
    # v7x: keep >= 2 row blocks on the parallel axis when possible so both TCs get work.
    if pl.cdiv(rows_pad, tbc) < 2 and rows_pad > 8:
        tbc = min(tbc, pl.cdiv(pl.cdiv(rows_pad, 2), 8) * 8)
    return int(tbc), int(thw)


def _pool_partial_sums(x_flat, rows, hw, tbc, thw, needs_mask, vmem_limit, buffer_count):
    grid = (pl.cdiv(rows, tbc), pl.cdiv(hw, thw))
    kernel = functools.partial(
        _pool_sum_kernel, hw_total=hw, thw=thw, needs_mask=needs_mask)

    x_spec_kw = {}
    if buffer_count is not None:
        x_spec_kw["pipeline_mode"] = pl.Buffered(buffer_count)

    itemsize = jnp.dtype(x_flat.dtype).itemsize
    cost = pl.CostEstimate(
        flops=int(rows * hw),
        transcendentals=0,
        bytes_accessed=int(rows * hw * itemsize + rows * 4),
    )

    return pl.pallas_call(
        kernel,
        out_shape=jax.ShapeDtypeStruct((rows, 1), jnp.float32),
        grid_spec=pltpu.PrefetchScalarGridSpec(
            num_scalar_prefetch=0,
            grid=grid,
            in_specs=[pl.BlockSpec((tbc, thw), lambda i, j: (i, j), **x_spec_kw)],
            out_specs=pl.BlockSpec((tbc, 1), lambda i, j: (i, 0)),
            scratch_shapes=[pltpu.VMEM((tbc, _LANE), jnp.float32)],
        ),
        compiler_params=pltpu.CompilerParams(
            dimension_semantics=("parallel", "arbitrary"),
            vmem_limit_bytes=int(vmem_limit),
        ),
        cost_estimate=cost,
    )(x_flat)


# ---------------------------------------------------------------------------
# Forward
# ---------------------------------------------------------------------------
def eq_linear_forward(x, weight, bias, lr_mul, *, tbc=None, thw=None):
    b, c, h, w = x.shape
    out_dim = weight.shape[0]
    hw = h * w
    rows = b * c

    scale = (1.0 / math.sqrt(c)) * lr_mul
    cs = scale * math.sqrt(2.0) / float(hw)                 # mean + scale + sqrt(2)
    bias_eff = (bias.astype(jnp.float32) * (lr_mul * math.sqrt(2.0))).reshape(1, out_dim)

    # Flatten (B, C_in) into one dense row axis; stream x in its own dtype.
    x_flat = x.reshape(rows, hw)
    itemsize = jnp.dtype(x.dtype).itemsize

    cap = _vmem_capacity_bytes()
    block_budget = min(16 << 20, cap // 6)                   # ~10.6 MiB on v7x, 16 MiB on v5e/v6e
    vmem_limit = min(int(cap * 3 // 4), 96 << 20)            # 48 MiB on v7x, 96 MiB on v5e/v6e

    auto_tbc, auto_thw = _pick_tiles(rows, hw, itemsize, block_budget)
    tbc = auto_tbc if tbc is None else max(8, pl.cdiv(int(tbc), 8) * 8)
    thw = auto_thw if thw is None else max(_LANE, pl.cdiv(int(thw), _LANE) * _LANE)
    needs_mask = (hw % thw) != 0

    # Heavy, memory-bound streaming reduce (triple-buffered x; fall back to the
    # default double buffering if this JAX build rejects pipeline_mode).
    try:
        partial_sums = _pool_partial_sums(
            x_flat, rows, hw, tbc, thw, needs_mask, vmem_limit, buffer_count=3)
    except Exception:
        partial_sums = _pool_partial_sums(
            x_flat, rows, hw, tbc, thw, needs_mask, vmem_limit, buffer_count=None)

    pooled = partial_sums.reshape(b, c)                       # tiny metadata-only regroup

    # Tiny epilogue: scaled GEMM + bias + fused leaky-relu (single-block Pallas call).
    return pl.pallas_call(
        functools.partial(_eq_linear_epilogue_kernel, cs=cs),
        out_shape=jax.ShapeDtypeStruct((b, out_dim), x.dtype),
    )(pooled, weight, bias_eff)


# ---------------------------------------------------------------------------
# Pure-JAX reference
# ---------------------------------------------------------------------------
def eq_linear_reference(x, weight, bias, lr_mul):
    b, c, h, w = x.shape
    scale = (1.0 / math.sqrt(c)) * lr_mul
    pooled = jnp.mean(x.astype(jnp.float32), axis=(2, 3))    # (B, C)
    y = pooled @ (weight.astype(jnp.float32) * scale).T + bias * lr_mul
    return jnp.where(y >= 0.0, y, 0.2 * y) * math.sqrt(2.0)


if __name__ == "__main__":
    key = jax.random.PRNGKey(0)
    kx, kw, kx2, kw2 = jax.random.split(key, 4)

    # --- case 1: nominal small shapes (single grid point) ---
    ch_in, ch_out, lr_mul = 4, 8, 0.01
    B, H, W = 2, 16, 16
    x = jax.random.normal(kx, (B, ch_in, H, W), dtype=jnp.float32)
    # EqualLinear.__init__: weight = randn(out, in) / lr_mul ; bias = zeros(out)
    weight = jax.random.normal(kw, (ch_out, ch_in), dtype=jnp.float32) / lr_mul
    bias = jnp.zeros((ch_out,), dtype=jnp.float32)

    out = jax.block_until_ready(eq_linear_forward(x, weight, bias, lr_mul))
    ref = eq_linear_reference(x, weight, bias, lr_mul)
    assert out.shape == (B, ch_out)
    assert jnp.allclose(out, ref, atol=1e-4, rtol=1e-4), float(jnp.max(jnp.abs(out - ref)))

    # --- case 2: exercise the tiled path (multiple row blocks + ragged HW blocks) ---
    B2, H2, W2 = 10, 20, 20
    x2 = jax.random.normal(kx2, (B2, ch_in, H2, W2), dtype=jnp.float32)
    weight2 = jax.random.normal(kw2, (ch_out, ch_in), dtype=jnp.float32) / lr_mul
    out2 = jax.block_until_ready(
        eq_linear_forward(x2, weight2, bias, lr_mul, tbc=8, thw=128)
    )
    ref2 = eq_linear_reference(x2, weight2, bias, lr_mul)
    assert out2.shape == (B2, ch_out)
    assert jnp.allclose(out2, ref2, atol=1e-4, rtol=1e-4), float(jnp.max(jnp.abs(out2 - ref2)))

    print("KERNEL_OK")
</pallas_src>

<mosaic_0001>
module attributes {stable_mosaic.version = 11 : i64} {
  func.func @_pool_sum_kernel(%arg0: i32, %arg1: i32, %arg2: memref<8x256xf32, #tpu.memory_space<vmem>>, %arg3: memref<8x1xf32, #tpu.memory_space<vmem>>, %arg4: memref<8x128xf32, #tpu.memory_space<vmem>>) attributes {dimension_semantics = [#tpu.dimension_semantics<parallel>, #tpu.dimension_semantics<arbitrary>], iteration_bounds = array<i64: 1, 1>, scalar_prefetch = 0 : i64, scratch_operands = 1 : i64, tpu.core_type = #tpu.core_type<tc>, window_params = [{transform_indices = @transform_0, window_bounds = array<i64: 8, 256>}, {transform_indices = @transform_1, window_bounds = array<i64: 8, 1>}]} {
    %c0_i32 = arith.constant 0 : i32
    %0 = arith.cmpi eq, %arg1, %c0_i32 : i32
    %1 = arith.extui %0 : i1 to i32
    %c0_i32_0 = arith.constant 0 : i32
    %2 = arith.cmpi ne, %1, %c0_i32_0 : i32
    scf.if %2 {
      %cst = arith.constant 0.000000e+00 : f32
      %12 = vector.broadcast %cst : f32 to vector<8x128xf32>
      %c0_9 = arith.constant 0 : index
      %c0_10 = arith.constant 0 : index
      %13 = vector.load %arg4[%c0_9, %c0_10] : memref<8x128xf32, #tpu.memory_space<vmem>>, vector<8x128xf32>
      tpu.vector_store %arg4[%c0_9, %c0_10], %12 {strides = array<i32>} : memref<8x128xf32, #tpu.memory_space<vmem>>, vector<8x128xf32>,
    } else {
    }
    %c0 = arith.constant 0 : index
    %c0_1 = arith.constant 0 : index
    %3 = vector.load %arg4[%c0, %c0_1] : memref<8x128xf32, #tpu.memory_space<vmem>>, vector<8x128xf32>
    %c0_2 = arith.constant 0 : index
    %c0_3 = arith.constant 0 : index
    %4 = vector.load %arg2[%c0_2, %c0_3] : memref<8x256xf32, #tpu.memory_space<vmem>>, vector<8x128xf32>
    %5 = arith.addf %3, %4 : vector<8x128xf32>
    %c0_4 = arith.constant 0 : index
    %c128 = arith.constant 128 : index
    %6 = vector.load %arg2[%c0_4, %c128] : memref<8x256xf32, #tpu.memory_space<vmem>>, vector<8x128xf32>
    %7 = arith.addf %5, %6 : vector<8x128xf32>
    %c0_5 = arith.constant 0 : index
    %c0_6 = arith.constant 0 : index
    %8 = vector.load %arg4[%c0_5, %c0_6] : memref<8x128xf32, #tpu.memory_space<vmem>>, vector<8x128xf32>
    tpu.vector_store %arg4[%c0_5, %c0_6], %7 {strides = array<i32>} : memref<8x128xf32, #tpu.memory_space<vmem>>, vector<8x128xf32>,
    %c0_i32_7 = arith.constant 0 : i32
    %9 = arith.cmpi eq, %arg1, %c0_i32_7 : i32
    %10 = arith.extui %9 : i1 to i32
    %c0_i32_8 = arith.constant 0 : i32
    %11 = arith.cmpi ne, %10, %c0_i32_8 : i32
    scf.if %11 {
      %c0_9 = arith.constant 0 : index
      %c0_10 = arith.constant 0 : index
      %12 = vector.load %arg4[%c0_9, %c0_10] : memref<8x128xf32, #tpu.memory_space<vmem>>, vector<8x128xf32>
      %cst = arith.constant dense<0.000000e+00> : vector<8xf32>
      %13 = vector.multi_reduction <add>, %12, %cst [1] : vector<8x128xf32> to vector<8xf32>
      %14 = vector.shape_cast %13 : vector<8xf32> to vector<8x1xf32>
      %c0_11 = arith.constant 0 : index
      %c0_12 = arith.constant 0 : index
      %15 = vector.load %arg3[%c0_11, %c0_12] : memref<8x1xf32, #tpu.memory_space<vmem>>, vector<8x1xf32>
      tpu.vector_store %arg3[%c0_11, %c0_12], %14 {strides = array<i32>} : memref<8x1xf32, #tpu.memory_space<vmem>>, vector<8x1xf32>,
    } else {
    }
    return
  }
  func.func @transform_0(%arg0: i32, %arg1: i32) -> (i32, i32) {
    %c0_i32 = arith.constant 0 : i32
    return %arg0, %arg1 : i32, i32
  }
  func.func @transform_1(%arg0: i32, %arg1: i32) -> (i32, i32) {
    %c0_i32 = arith.constant 0 : i32
    %c0_i32_0 = arith.constant 0 : i32
    return %arg0, %c0_i32 : i32, i32
  }
}

</mosaic_0001>

<bundles_post_ra>
// kernel: tpu_custom_call.1
= control target key start
LH: loop header
LB: loop body
LE: loop exit
PB: predicated region body
PF: predicated region fallthrough
CT: control target
= control target key end

     0   :  { %6 = vsyncpa [#allocation4], 0  ;;  %s73_s9 = smov [#allocation3]   ;;  %s90_s0 = inlined_call_operand.hbm [shape: f32[8,256], index: 0, kind: input, shape index: {}]   ;;  %s91_s1 = inlined_call_operand.vmem [shape: f32[8,1], index: 1, kind: output, shape index: {}]  }
   0x1   :  { %s12_s8 = sshll.u32 %s90_s0, 4  ;;  %s14_s10 = sshll.u32 %s73_s9, 4  ;;  %s13_s8 = int_to_ptr.hbm [resolvable:$true] %s12_s8  ;;  %s15_s10 = int_to_ptr.vmem [resolvable:$true] %s14_s10 }
   0x2   :  { %17 = dma.hbm_to_vmem [thread:$0]  %s13_s8, 256, %s15_s10, [#allocation4]  }
   0x3   :  { %71 = dma.done.wait [#allocation4], 256  }
   0x4   :  { %72 = vsyncadd [#allocation4], 4294967040  ;;  %v28_v0 = vld [vmem:[#allocation3] sm:$0xff]  ;;  %v30_v1 = vld [vmem:[#allocation3 + $0x8] sm:$0xff]  ;;  %vm39_vm0 = vcmask 7168  }
   0x5   :  { %v31_v2 = vadd.f32 %v30_v1, %v28_v0 }
   0x7   :  { %37 = vadd.xlane.f32.xlu0 %v31_v2 }
  0x7a   :  { %v38_v3 = vpop.xlane.xlu0 %37 }
  0x7b   :  { %40 = vst.msk [vmem:[%s91_s1] sm:$0xff] %vm39_vm0, %v38_v3 }
  0x7c   :  { %45 = vsyncpa [#allocation4], 1 }

</bundles_post_ra>
